<compile_context>
chip_gen: v7x
topology: tpu7x:2x2x1
jax: 0.10.0
libtpu: 0.0.40
codegen_flags: <defaults>
</compile_context>

<pallas_src>
import jax
import jax.numpy as jnp
from jax.experimental import pallas as pl
from jax.experimental.pallas import tpu as pltpu


def _round_up(n, m):
    return ((n + m - 1) // m) * m


def mlp_kernel(x_ref, w1_ref, b1_ref, w2_ref, b2_ref, w3_ref, b3_ref, o_ref):
    # Fused 3-layer MLP hot path: bf16 matmuls on the MXU with f32 accumulation,
    # bias-add + ReLU on the VPU in f32.
    x = x_ref[...]
    h1 = jnp.dot(x, w1_ref[...], preferred_element_type=jnp.float32) + b1_ref[...]
    h1 = jnp.maximum(h1, 0.0).astype(w2_ref.dtype)
    h2 = jnp.dot(h1, w2_ref[...], preferred_element_type=jnp.float32) + b2_ref[...]
    h2 = jnp.maximum(h2, 0.0).astype(w3_ref.dtype)
    out = jnp.dot(h2, w3_ref[...], preferred_element_type=jnp.float32) + b3_ref[...]
    o_ref[...] = out.astype(o_ref.dtype)


def mlp_forward(x_nchw, params, *, compute_dtype=jnp.bfloat16, max_tile_b=512):
    """x_nchw: [B, C, H, W] -> logits [B, num_classes] (f32)."""
    w1, b1, w2, b2, w3, b3 = params
    B = x_nchw.shape[0]
    D, H = w1.shape
    C = w3.shape[1]

    # --- Lane-pad every feature dim to a multiple of 128 (vreg lane width). ---
    D_pad = _round_up(D, 128)
    H_pad = _round_up(H, 128)
    C_pad = _round_up(C, 128)

    # --- Batch tiling: sublane-pad B to a multiple of 8, tile the grid. ---
    if B <= max_tile_b:
        tile_b = _round_up(B, 8)
        B_pad = tile_b
    else:
        tile_b = max_tile_b
        B_pad = _round_up(B, tile_b)

    # Flatten exactly like nn.Flatten (row-major over C, H, W), then pad.
    x = x_nchw.reshape(B, D)
    x = jnp.pad(x, ((0, B_pad - B), (0, D_pad - D))).astype(compute_dtype)

    # Zero-pad weights/biases. Padded columns stay exactly zero, so padded
    # hidden units are dead through ReLU and padded logits are exactly zero;
    # slicing back to C below is exact.
    w1p = jnp.pad(w1, ((0, D_pad - D), (0, H_pad - H))).astype(compute_dtype)
    w2p = jnp.pad(w2, ((0, H_pad - H), (0, H_pad - H))).astype(compute_dtype)
    w3p = jnp.pad(w3, ((0, H_pad - H), (0, C_pad - C))).astype(compute_dtype)
    b1p = jnp.pad(b1, ((0, 0), (0, H_pad - H))).astype(jnp.float32)
    b2p = jnp.pad(b2, ((0, 0), (0, H_pad - H))).astype(jnp.float32)
    b3p = jnp.pad(b3, ((0, 0), (0, C_pad - C))).astype(jnp.float32)

    grid = (B_pad // tile_b,)

    itemsize = jnp.dtype(compute_dtype).itemsize
    flops = 2 * B_pad * (D_pad * H_pad + H_pad * H_pad + H_pad * C_pad)
    bytes_accessed = (
        B_pad * D_pad * itemsize                                         # x
        + (D_pad * H_pad + H_pad * H_pad + H_pad * C_pad) * itemsize     # weights
        + (2 * H_pad + C_pad) * 4                                        # biases
        + B_pad * C_pad * 4                                              # out
    )

    out = pl.pallas_call(
        mlp_kernel,
        out_shape=jax.ShapeDtypeStruct((B_pad, C_pad), jnp.float32),
        grid=grid,
        in_specs=[
            pl.BlockSpec((tile_b, D_pad), lambda b: (b, 0)),   # x: tiled over batch
            pl.BlockSpec((D_pad, H_pad), lambda b: (0, 0)),    # w1: VMEM-resident
            pl.BlockSpec((1, H_pad),     lambda b: (0, 0)),    # b1
            pl.BlockSpec((H_pad, H_pad), lambda b: (0, 0)),    # w2
            pl.BlockSpec((1, H_pad),     lambda b: (0, 0)),    # b2
            pl.BlockSpec((H_pad, C_pad), lambda b: (0, 0)),    # w3
            pl.BlockSpec((1, C_pad),     lambda b: (0, 0)),    # b3
        ],
        out_specs=pl.BlockSpec((tile_b, C_pad), lambda b: (b, 0)),
        compiler_params=pltpu.CompilerParams(
            # Batch tiles are independent -> shard across v7x's 2 TCs.
            dimension_semantics=("parallel",),
        ),
        cost_estimate=pl.CostEstimate(
            flops=flops, transcendentals=0, bytes_accessed=bytes_accessed),
    )(x, w1p, b1p, w2p, b2p, w3p, b3p)

    # Slice padded batch rows and padded logit columns back to true sizes.
    return out[:B, :C]


def init_params(key, d_in, hidden, num_classes):
    k1, k2, k3, k4, k5, k6 = jax.random.split(key, 6)
    scale1 = 1.0 / jnp.sqrt(d_in)
    scale2 = 1.0 / jnp.sqrt(hidden)
    w1 = jax.random.uniform(k1, (d_in, hidden), jnp.float32, -scale1, scale1)
    b1 = jax.random.uniform(k2, (1, hidden), jnp.float32, -scale1, scale1)
    w2 = jax.random.uniform(k3, (hidden, hidden), jnp.float32, -scale2, scale2)
    b2 = jax.random.uniform(k4, (1, hidden), jnp.float32, -scale2, scale2)
    w3 = jax.random.uniform(k5, (hidden, num_classes), jnp.float32, -scale2, scale2)
    b3 = jax.random.uniform(k6, (1, num_classes), jnp.float32, -scale2, scale2)
    return (w1, b1, w2, b2, w3, b3)


def mlp_reference(x_nchw, params):
    w1, b1, w2, b2, w3, b3 = params
    x = x_nchw.reshape(x_nchw.shape[0], -1).astype(jnp.float32)
    h1 = jnp.maximum(x @ w1 + b1, 0.0)
    h2 = jnp.maximum(h1 @ w2 + b2, 0.0)
    return h2 @ w3 + b3


if __name__ == "__main__":
    key = jax.random.PRNGKey(0)
    k_x, k_p = jax.random.split(key)

    B, C_in, Hh, Ww = 2, 1, 16, 16          # small NCHW input
    D = C_in * Hh * Ww                      # 256 flattened features
    HIDDEN, NUM_CLASSES = 32, 10

    x = jax.random.normal(k_x, (B, C_in, Hh, Ww), dtype=jnp.float32)
    params = init_params(k_p, D, HIDDEN, NUM_CLASSES)

    out = mlp_forward(x, params)
    out = jax.block_until_ready(out)

    ref = mlp_reference(x, params)
    assert out.shape == (B, NUM_CLASSES)
    # bf16 inputs with f32 accumulation -> loose tolerance vs. pure-f32 ref.
    assert jnp.allclose(out, ref, atol=5e-2, rtol=5e-2), float(
        jnp.max(jnp.abs(out - ref)))

    print("KERNEL_OK")
</pallas_src>

<mosaic_0001>
module attributes {stable_mosaic.version = 11 : i64} {
  func.func @mlp_kernel(%arg0: i32, %arg1: memref<8x256xbf16, #tpu.memory_space<vmem>>, %arg2: memref<256x128xbf16, #tpu.memory_space<vmem>>, %arg3: memref<1x128xf32, #tpu.memory_space<vmem>>, %arg4: memref<128x128xbf16, #tpu.memory_space<vmem>>, %arg5: memref<1x128xf32, #tpu.memory_space<vmem>>, %arg6: memref<128x128xbf16, #tpu.memory_space<vmem>>, %arg7: memref<1x128xf32, #tpu.memory_space<vmem>>, %arg8: memref<8x128xf32, #tpu.memory_space<vmem>>) attributes {dimension_semantics = [#tpu.dimension_semantics<parallel>], iteration_bounds = array<i64: 1>, scalar_prefetch = 0 : i64, scratch_operands = 0 : i64, tpu.core_type = #tpu.core_type<tc>, window_params = [{transform_indices = @transform_0, window_bounds = array<i64: 8, 256>}, {pipeline_mode = #tpu.pipeline_mode<synchronous>, transform_indices = @transform_1, window_bounds = array<i64: 256, 128>}, {pipeline_mode = #tpu.pipeline_mode<synchronous>, transform_indices = @transform_2, window_bounds = array<i64: 1, 128>}, {pipeline_mode = #tpu.pipeline_mode<synchronous>, transform_indices = @transform_3, window_bounds = array<i64: 128, 128>}, {pipeline_mode = #tpu.pipeline_mode<synchronous>, transform_indices = @transform_4, window_bounds = array<i64: 1, 128>}, {pipeline_mode = #tpu.pipeline_mode<synchronous>, transform_indices = @transform_5, window_bounds = array<i64: 128, 128>}, {pipeline_mode = #tpu.pipeline_mode<synchronous>, transform_indices = @transform_6, window_bounds = array<i64: 1, 128>}, {transform_indices = @transform_7, window_bounds = array<i64: 8, 128>}]} {
    %c0 = arith.constant 0 : index
    %c0_0 = arith.constant 0 : index
    %0 = vector.load %arg1[%c0, %c0_0] : memref<8x256xbf16, #tpu.memory_space<vmem>>, vector<8x256xbf16>
    %c0_1 = arith.constant 0 : index
    %c0_2 = arith.constant 0 : index
    %1 = vector.load %arg2[%c0_1, %c0_2] : memref<256x128xbf16, #tpu.memory_space<vmem>>, vector<256x128xbf16>
    %cst = arith.constant dense<0.000000e+00> : vector<8x128xf32>
    %2 = tpu.matmul %0, %1, %cst {dimension_numbers = #tpu.dot_dimension_numbers<[1], [0], [0], [1], [0, 0, 1, 1], [], []>} : vector<8x256xbf16>, vector<256x128xbf16>, vector<8x128xf32> -> vector<8x128xf32>
    %c0_3 = arith.constant 0 : index
    %c0_4 = arith.constant 0 : index
    %3 = vector.load %arg3[%c0_3, %c0_4] : memref<1x128xf32, #tpu.memory_space<vmem>>, vector<1x128xf32>
    %4 = vector.broadcast %3 : vector<1x128xf32> to vector<8x128xf32>
    %5 = arith.addf %2, %4 : vector<8x128xf32>
    %cst_5 = arith.constant 0.000000e+00 : f32
    %6 = vector.broadcast %cst_5 : f32 to vector<8x128xf32>
    %7 = arith.maximumf %5, %6 : vector<8x128xf32>
    %8 = arith.truncf %7 : vector<8x128xf32> to vector<8x128xbf16>
    %c0_6 = arith.constant 0 : index
    %c0_7 = arith.constant 0 : index
    %9 = vector.load %arg4[%c0_6, %c0_7] : memref<128x128xbf16, #tpu.memory_space<vmem>>, vector<128x128xbf16>
    %cst_8 = arith.constant dense<0.000000e+00> : vector<8x128xf32>
    %10 = tpu.matmul %8, %9, %cst_8 {dimension_numbers = #tpu.dot_dimension_numbers<[1], [0], [0], [1], [0, 0, 1, 1], [], []>} : vector<8x128xbf16>, vector<128x128xbf16>, vector<8x128xf32> -> vector<8x128xf32>
    %c0_9 = arith.constant 0 : index
    %c0_10 = arith.constant 0 : index
    %11 = vector.load %arg5[%c0_9, %c0_10] : memref<1x128xf32, #tpu.memory_space<vmem>>, vector<1x128xf32>
    %12 = vector.broadcast %11 : vector<1x128xf32> to vector<8x128xf32>
    %13 = arith.addf %10, %12 : vector<8x128xf32>
    %cst_11 = arith.constant 0.000000e+00 : f32
    %14 = vector.broadcast %cst_11 : f32 to vector<8x128xf32>
    %15 = arith.maximumf %13, %14 : vector<8x128xf32>
    %16 = arith.truncf %15 : vector<8x128xf32> to vector<8x128xbf16>
    %c0_12 = arith.constant 0 : index
    %c0_13 = arith.constant 0 : index
    %17 = vector.load %arg6[%c0_12, %c0_13] : memref<128x128xbf16, #tpu.memory_space<vmem>>, vector<128x128xbf16>
    %cst_14 = arith.constant dense<0.000000e+00> : vector<8x128xf32>
    %18 = tpu.matmul %16, %17, %cst_14 {dimension_numbers = #tpu.dot_dimension_numbers<[1], [0], [0], [1], [0, 0, 1, 1], [], []>} : vector<8x128xbf16>, vector<128x128xbf16>, vector<8x128xf32> -> vector<8x128xf32>
    %c0_15 = arith.constant 0 : index
    %c0_16 = arith.constant 0 : index
    %19 = vector.load %arg7[%c0_15, %c0_16] : memref<1x128xf32, #tpu.memory_space<vmem>>, vector<1x128xf32>
    %20 = vector.broadcast %19 : vector<1x128xf32> to vector<8x128xf32>
    %21 = arith.addf %18, %20 : vector<8x128xf32>
    %c0_17 = arith.constant 0 : index
    %c0_18 = arith.constant 0 : index
    %22 = vector.load %arg8[%c0_17, %c0_18] : memref<8x128xf32, #tpu.memory_space<vmem>>, vector<8x128xf32>
    tpu.vector_store %arg8[%c0_17, %c0_18], %21 {strides = array<i32>} : memref<8x128xf32, #tpu.memory_space<vmem>>, vector<8x128xf32>,
    return
  }
  func.func @transform_0(%arg0: i32) -> (i32, i32) {
    %c0_i32 = arith.constant 0 : i32
    %c0_i32_0 = arith.constant 0 : i32
    return %arg0, %c0_i32 : i32, i32
  }
  func.func @transform_1(%arg0: i32) -> (i32, i32) {
    %c0_i32 = arith.constant 0 : i32
    %c0_i32_0 = arith.constant 0 : i32
    %c0_i32_1 = arith.constant 0 : i32
    return %c0_i32, %c0_i32_0 : i32, i32
  }
  func.func @transform_2(%arg0: i32) -> (i32, i32) {
    %c0_i32 = arith.constant 0 : i32
    %c0_i32_0 = arith.constant 0 : i32
    %c0_i32_1 = arith.constant 0 : i32
    return %c0_i32, %c0_i32_0 : i32, i32
  }
  func.func @transform_3(%arg0: i32) -> (i32, i32) {
    %c0_i32 = arith.constant 0 : i32
    %c0_i32_0 = arith.constant 0 : i32
    %c0_i32_1 = arith.constant 0 : i32
    return %c0_i32, %c0_i32_0 : i32, i32
  }
  func.func @transform_4(%arg0: i32) -> (i32, i32) {
    %c0_i32 = arith.constant 0 : i32
    %c0_i32_0 = arith.constant 0 : i32
    %c0_i32_1 = arith.constant 0 : i32
    return %c0_i32, %c0_i32_0 : i32, i32
  }
  func.func @transform_5(%arg0: i32) -> (i32, i32) {
    %c0_i32 = arith.constant 0 : i32
    %c0_i32_0 = arith.constant 0 : i32
    %c0_i32_1 = arith.constant 0 : i32
    return %c0_i32, %c0_i32_0 : i32, i32
  }
  func.func @transform_6(%arg0: i32) -> (i32, i32) {
    %c0_i32 = arith.constant 0 : i32
    %c0_i32_0 = arith.constant 0 : i32
    %c0_i32_1 = arith.constant 0 : i32
    return %c0_i32, %c0_i32_0 : i32, i32
  }
  func.func @transform_7(%arg0: i32) -> (i32, i32) {
    %c0_i32 = arith.constant 0 : i32
    %c0_i32_0 = arith.constant 0 : i32
    return %arg0, %c0_i32 : i32, i32
  }
}

</mosaic_0001>

<bundles_post_ra>
// kernel: tpu_custom_call.1
= control target key start
LH: loop header
LB: loop body
LE: loop exit
PB: predicated region body
PF: predicated region fallthrough
CT: control target
= control target key end

     0   :  { %12 = vsyncpa [#allocation3], 0  ;;  %s931_s0 = inlined_call_operand.hbm [shape: bf16[8,256], index: 0, kind: input, shape index: {}]   ;;  %s932_s1 = inlined_call_operand.hbm [shape: bf16[256,128], index: 1, kind: input, shape index: {}]   ;;  %s933_s2 = inlined_call_operand.vmem [shape: f32[1,128], index: 2, kind: input, shape index: {}]   ;;  %s934_s3 = inlined_call_operand.hbm [shape: bf16[128,128], index: 3, kind: input, shape index: {}]   ;;  %s935_s4 = inlined_call_operand.vmem [shape: f32[1,128], index: 4, kind: input, shape index: {}]   ;;  %s936_s5 = inlined_call_operand.hbm [shape: bf16[128,128], index: 5, kind: input, shape index: {}]   ;;  %s937_s6 = inlined_call_operand.vmem [shape: f32[1,128], index: 6, kind: input, shape index: {}]   ;;  %s938_s7 = inlined_call_operand.hbm [shape: f32[8,128], index: 7, kind: output, shape index: {}]  }
   0x1   :  { %13 = vsyncpa [#allocation6], 0 }
   0x2   :  { %14 = vsyncpa [#allocation9], 0 }
   0x3   :  { %15 = vsyncpa [#allocation4], 0  ;;  %s786_s24 = smov [#allocation5]   ;;  %s668_s28 = scalar_lea.hbm %s932_s1, 2048 }
   0x4   :  { %s31_s25 = sshll.u32 %s786_s24, 4  ;;  %p669_p0 = scmp.ne.s32.totalorder %s932_s1, %s668_s28  ;;  %s32_s25 = int_to_ptr.vmem [resolvable:$true] %s31_s25 }
   0x5   :  { %p672_p1 = scmp.lt.u32.totalorder %s668_s28, %s932_s1 }
   0x7   :  { %p674_p2 = pnand %p672_p1, %p669_p0 }
   0x9   :  { %677 = shalt.err (!%p674_p2)
}
   0xa   :  { %s678_s10 = scalar_lea.vmem %s32_s25, 2048  ;;  %p683_p4 = scmp.lt.s32.totalorder %s32_s25, %s32_s25 }
   0xb   :  { %p679_p3 = scmp.ne.s32.totalorder %s32_s25, %s678_s10  ;;  %p684_p5 = scmp.lt.s32.totalorder %s678_s10, %s678_s10 }
   0xd   :  { %p685_p6 = por %p684_p5, %p683_p4 }
   0xf   :  { %p686_p7 = pnand %p685_p6, %p679_p3 }
  0x11   :  { %689 = shalt.err (!%p686_p7)
}
  0x12   :  { %s787_s11 = smov 64   ;;  %s788_s12 = smov 4  }
  0x13   :  { %37 = dma.hbm_to_vmem [thread:$0]  %s932_s1, 2048, %s32_s25, [#allocation6], %s787_s11, %s787_s11, %s788_s12  }
  0x14   :  { %s789_s15 = smov [#allocation2]   ;;  %s790_s17 = smov [#allocation7]  }
  0x15   :  { %s22_s16 = sshll.u32 %s789_s15, 4  ;;  %s45_s18 = sshll.u32 %s790_s17, 4  ;;  %s23_s16 = int_to_ptr.vmem [resolvable:$true] %s22_s16  ;;  %s46_s18 = int_to_ptr.vmem [resolvable:$true] %s45_s18 }
  0x16   :  { %s690_s21 = scalar_lea.hbm %s931_s0, 128 }
  0x17   :  { %p691_p8 = scmp.ne.s32.totalorder %s931_s0, %s690_s21  ;;  %p694_p9 = scmp.lt.u32.totalorder %s690_s21, %s931_s0 }
  0x19   :  { %p696_p10 = pnand %p694_p9, %p691_p8 }
  0x1b   :  { %699 = shalt.err (!%p696_p10)
}
  0x1c   :  { %s700_s1 = scalar_lea.vmem %s23_s16, 128  ;;  %p705_p12 = scmp.lt.s32.totalorder %s23_s16, %s23_s16 }
  0x1d   :  { %p701_p11 = scmp.ne.s32.totalorder %s23_s16, %s700_s1  ;;  %p706_p13 = scmp.lt.s32.totalorder %s700_s1, %s700_s1 }
  0x1f   :  { %p707_p0 = por %p706_p13, %p705_p12 }
  0x21   :  { %p708_p1 = pnand %p707_p0, %p701_p11 }
  0x23   :  { %711 = shalt.err (!%p708_p1)
}
  0x24   :  { %25 = dma.hbm_to_vmem [thread:$0]  %s931_s0, 128, %s23_s16, [#allocation3]  }
  0x25   :  { %s712_s30 = scalar_lea.hbm %s934_s3, 1024 }
  0x26   :  { %p713_p2 = scmp.ne.s32.totalorder %s934_s3, %s712_s30  ;;  %p716_p3 = scmp.lt.u32.totalorder %s712_s30, %s934_s3 }
  0x28   :  { %p718_p4 = pnand %p716_p3, %p713_p2 }
  0x2a   :  { %721 = shalt.err (!%p718_p4)
}
  0x2b   :  { %s722_s14 = scalar_lea.vmem %s46_s18, 1024  ;;  %p727_p6 = scmp.lt.s32.totalorder %s46_s18, %s46_s18 }
  0x2c   :  { %p723_p5 = scmp.ne.s32.totalorder %s46_s18, %s722_s14  ;;  %p728_p7 = scmp.lt.s32.totalorder %s722_s14, %s722_s14 }
  0x2e   :  { %p729_p8 = por %p728_p7, %p727_p6 }
  0x30   :  { %p730_p9 = pnand %p729_p8, %p723_p5 }
  0x32   :  { %733 = shalt.err (!%p730_p9)
}
  0x33   :  { %51 = dma.hbm_to_vmem [thread:$0]  %s934_s3, 1024, %s46_s18, [#allocation6], %s787_s11, %s787_s11, %s788_s12  }
  0x34   :  { %s791_s16 = smov [#allocation8]   ;;  %s734_s21 = scalar_lea.hbm %s936_s5, 1024 }
  0x35   :  { %s59_s17 = sshll.u32 %s791_s16, 4  ;;  %p735_p10 = scmp.ne.s32.totalorder %s936_s5, %s734_s21  ;;  %s60_s17 = int_to_ptr.vmem [resolvable:$true] %s59_s17 }
  0x36   :  { %p738_p11 = scmp.lt.u32.totalorder %s734_s21, %s936_s5 }
  0x38   :  { %p740_p12 = pnand %p738_p11, %p735_p10 }
  0x3a   :  { %743 = shalt.err (!%p740_p12)
}
  0x3b   :  { %s744_s1 = scalar_lea.vmem %s60_s17, 1024  ;;  %p749_p0 = scmp.lt.s32.totalorder %s60_s17, %s60_s17 }
  0x3c   :  { %p745_p13 = scmp.ne.s32.totalorder %s60_s17, %s744_s1  ;;  %p750_p1 = scmp.lt.s32.totalorder %s744_s1, %s744_s1 }
  0x3e   :  { %p751_p2 = por %p750_p1, %p749_p0 }
  0x40   :  { %p752_p3 = pnand %p751_p2, %p745_p13 }
  0x42   :  { %755 = shalt.err (!%p752_p3)
}
  0x43   :  { %65 = dma.hbm_to_vmem [thread:$0]  %s936_s5, 1024, %s60_s17, [#allocation9], %s787_s11, %s787_s11, %s788_s12  }
  0x44   :  { %778 = dma.done.wait [#allocation3], 128  }
  0x45   :  { %779 = vsyncadd [#allocation3], 4294967168 }
  0x46   :  { %780 = dma.done.wait [#allocation6], 3072  }
  0x47   :  { %781 = vsyncadd [#allocation6], 4294964224 }
  0x48   :  { %782 = dma.done.wait [#allocation9], 1024  }
  0x49   :  { %783 = vsyncadd [#allocation9], 4294966272  ;;  %v792_v0 = vmov 0.0   ;;  %v634_v1 = vld [vmem:[#allocation5 + $0x40] sm:$0xff]   ;;  %v636_v3 = vld [vmem:[#allocation5 + $0x48] sm:$0xff]   ;;  %vm793_vm0 = vmmov 0  }
  0x4a   :  { %585 = vmatprep.subr.bf16.mxu1 %v792_v0  ;;  %v635_v2 = vld [vmem:[#allocation5] sm:$0xff]   ;;  %545 = vmatprep.subr.bf16.mxu0 %v634_v1  ;;  %v637_v4 = vld [vmem:[#allocation5 + $0x8] sm:$0xff]   ;;  %v638_v5 = vld [vmem:[#allocation5 + $0x50] sm:$0xff]   ;;  %s794_s28 = smov [#allocation10]  }
  0x4b   :  { %546 = vmatpush3.bf16.msra.mxu0 %v635_v2  ;;  %v639_v6 = vld [vmem:[#allocation5 + $0x10] sm:$0xff]   ;;  %v640_v7 = vld [vmem:[#allocation5 + $0x58] sm:$0xff]   ;;  %v642_v9 = vld [vmem:[#allocation5 + $0x60] sm:$0xff]   ;;  %601 = vmatprep.mubr.msk.bf16.mxu1 %vm793_vm0, %v792_v0  ;;  %s497_s29 = sshll.u32 %s794_s28, 4  ;;  %s498_s29 = int_to_ptr.vmem [resolvable:$true] %s497_s29 }
  0x4c   :  { %547 = vmatprep.subr.bf16.mxu0 %v636_v3  ;;  %v641_v8 = vld [vmem:[#allocation5 + $0x18] sm:$0xff]   ;;  %v643_v10 = vld [vmem:[#allocation5 + $0x20] sm:$0xff]   ;;  %v644_v11 = vld [vmem:[#allocation5 + $0x68] sm:$0xff]   ;;  %p761_p5 = scmp.lt.s32.totalorder %s498_s29, %s498_s29 }
  0x4d   :  { %v81_v12 = vld [vmem:[#allocation2] sm:$0xff]  ;;  %v652_v14 = vld [vmem:[#allocation7] sm:$0xff]   ;;  %v645_v15 = vld [vmem:[#allocation5 + $0x28] sm:$0xff]  }
  0x4e   :  { %v510_v13 = vcombine.high %v81_v12, %v81_v12  ;;  %v646_v16 = vld [vmem:[#allocation5 + $0x70] sm:$0xff]   ;;  %586 = vmatpush3.bf16.msra.mxu1 %v652_v14  ;;  %v653_v17 = vld [vmem:[#allocation7 + $0x8] sm:$0xff]   ;;  %v648_v19 = vld [vmem:[#allocation5 + $0x78] sm:$0xff]   ;;  %v509_v23 = vcombine.low %v81_v12, %v81_v12 }
  0x4f   :  { %548 = vmatpush3.bf16.msra.mxu0 %v637_v4  ;;  %v647_v18 = vld [vmem:[#allocation5 + $0x30] sm:$0xff]   ;;  %587 = vmatprep.subr.bf16.mxu1 %v792_v0  ;;  %v649_v21 = vld [vmem:[#allocation5 + $0x38] sm:$0xff]   ;;  %v656_v24 = vld [vmem:[#allocation7 + $0x20] sm:$0xff]  }
  0x50   :  { %549 = vmatprep.subr.bf16.mxu0 %v638_v5  ;;  %256 = vmatprep.mubr.bf16.mxu0 %v510_v13  ;;  %v654_v20 = vld [vmem:[#allocation7 + $0x10] sm:$0xff]   ;;  %v655_v22 = vld [vmem:[#allocation7 + $0x18] sm:$0xff]   ;;  %v657_v25 = vld [vmem:[#allocation7 + $0x28] sm:$0xff]  }
  0x51   :  { %v658_v26 = vld [vmem:[#allocation7 + $0x30] sm:$0xff]   ;;  %v659_v27 = vld [vmem:[#allocation7 + $0x38] sm:$0xff]   ;;  %v660_v28 = vld [vmem:[#allocation8] sm:$0xff]  }
  0x52   :  { %588 = vmatpush3.bf16.msra.mxu1 %v653_v17  ;;  %v661_v29 = vld [vmem:[#allocation8 + $0x8] sm:$0xff]   ;;  %v662_v30 = vld [vmem:[#allocation8 + $0x10] sm:$0xff]   ;;  %v663_v31 = vld [vmem:[#allocation8 + $0x18] sm:$0xff]  }
  0x53   :  { %550 = vmatpush3.bf16.msra.mxu0 %v639_v6  ;;  %589 = vmatprep.subr.bf16.mxu1 %v792_v0  ;;  %v664_v32 = vld [vmem:[#allocation8 + $0x20] sm:$0xff]   ;;  %v665_v33 = vld [vmem:[#allocation8 + $0x28] sm:$0xff]   ;;  %v508_v35 = vld [vmem:[%s933_s2] ss:$0 sm:$0xff] }
  0x54   :  { %551 = vmatprep.subr.bf16.mxu0 %v640_v7  ;;  %v666_v43 = vld [vmem:[#allocation8 + $0x30] sm:$0xff]   ;;  %v667_v44 = vld [vmem:[#allocation8 + $0x38] sm:$0xff]  }
  0x55   :  { %v527_v45 = vld [vmem:[%s935_s4] ss:$0 sm:$0xff]  ;;  %s756_s4 = scalar_lea.vmem %s498_s29, 128 }
  0x56   :  { %590 = vmatpush3.bf16.msra.mxu1 %v654_v20  ;;  %v536_v53 = vld [vmem:[%s937_s6] ss:$0 sm:$0xff]  ;;  %p757_p4 = scmp.ne.s32.totalorder %s498_s29, %s756_s4  ;;  %p762_p6 = scmp.lt.s32.totalorder %s756_s4, %s756_s4 }
  0x57   :  { %552 = vmatpush3.bf16.msra.mxu0 %v641_v8  ;;  %591 = vmatprep.subr.bf16.mxu1 %v792_v0 }
  0x58   :  { %553 = vmatprep.subr.bf16.mxu0 %v642_v9  ;;  %p763_p7 = por %p762_p6, %p761_p5 }
  0x5a   :  { %592 = vmatpush3.bf16.msra.mxu1 %v655_v22  ;;  %p764_p8 = pnand %p763_p7, %p757_p4 }
  0x5b   :  { %554 = vmatpush3.bf16.msra.mxu0 %v643_v10  ;;  %593 = vmatprep.subr.bf16.mxu1 %v792_v0 }
  0x5c   :  { %555 = vmatprep.subr.bf16.mxu0 %v644_v11 }
  0x5e   :  { %594 = vmatpush3.bf16.msra.mxu1 %v656_v24 }
  0x5f   :  { %556 = vmatpush3.bf16.msra.mxu0 %v645_v15  ;;  %595 = vmatprep.subr.bf16.mxu1 %v792_v0 }
  0x60   :  { %557 = vmatprep.subr.bf16.mxu0 %v646_v16 }
  0x62   :  { %596 = vmatpush3.bf16.msra.mxu1 %v657_v25 }
  0x63   :  { %558 = vmatpush3.bf16.msra.mxu0 %v647_v18  ;;  %597 = vmatprep.subr.bf16.mxu1 %v792_v0 }
  0x64   :  { %559 = vmatprep.subr.bf16.mxu0 %v648_v19 }
  0x66   :  { %598 = vmatpush3.bf16.msra.mxu1 %v658_v26 }
  0x67   :  { %560 = vmatpush3.bf16.msra.mxu0 %v649_v21  ;;  %599 = vmatprep.subr.bf16.mxu1 %v792_v0 }
  0x68   :  { %605 = vmatprep.subr.bf16.mxu0 %v792_v0 }
  0x6a   :  { %257 = vmatmul.mubr.bf16.vlgmr.msra.gmra.mrb[0].mxu0 %v509_v23  ;;  %600 = vmatpush3.bf16.msra.mxu1 %v659_v27 }
  0x6b   :  { %621 = vmatprep.mubr.msk.bf16.mxu0 %vm793_vm0, %v792_v0  ;;  %606 = vmatpush3.bf16.msra.mxu0 %v660_v28 }
  0x6c   :  { %607 = vmatprep.subr.bf16.mxu0 %v792_v0 }
  0x6f   :  { %608 = vmatpush3.bf16.msra.mxu0 %v661_v29 }
  0x70   :  { %609 = vmatprep.subr.bf16.mxu0 %v792_v0 }
  0x73   :  { %610 = vmatpush3.bf16.msra.mxu0 %v662_v30 }
  0x74   :  { %611 = vmatprep.subr.bf16.mxu0 %v792_v0 }
  0x77   :  { %612 = vmatpush3.bf16.msra.mxu0 %v663_v31 }
  0x78   :  { %613 = vmatprep.subr.bf16.mxu0 %v792_v0 }
  0x7b   :  { %614 = vmatpush3.bf16.msra.mxu0 %v664_v32 }
  0x7c   :  { %615 = vmatprep.subr.bf16.mxu0 %v792_v0 }
  0x7f   :  { %616 = vmatpush3.bf16.msra.mxu0 %v665_v33 }
  0x80   :  { %617 = vmatprep.subr.bf16.mxu0 %v792_v0 }
  0x83   :  { %618 = vmatpush3.bf16.msra.mxu0 %v666_v43 }
  0x84   :  { %619 = vmatprep.subr.bf16.mxu0 %v792_v0 }
  0x87   :  { %620 = vmatpush3.bf16.msra.mxu0 %v667_v44 }
 0x13d   :  { %v561_v34 = vpop.f32.mrb[0].mxu0 }
 0x13e   :  { %v562_v36 = vpop.f32.mrb[1].mxu0 }
 0x13f   :  { %v563_v37 = vadd.f32 %v562_v36, %v561_v34  ;;  %v564_v38 = vpop.f32.mrb[2].mxu0 }
 0x140   :  { %v565_v39 = vpop.f32.mrb[3].mxu0 }
 0x141   :  { %v259_v40 = vadd.f32 %v563_v37, %v508_v35 }
 0x143   :  { %v264_v41 = vmax.f32 %v259_v40, 0.0 }
 0x145   :  { %v265_v42 = vpack.c.bf16 %v264_v41, %v264_v41 }
 0x147   :  { %602 = vmatmul.mubr.bf16.vlgmr.msra.gmra.mrb[0].mxu1 %v265_v42 }
 0x21a   :  { %v371_v46 = vpop.f32.mrb[0].mxu1 }
 0x21b   :  { %v372_v47 = vadd.f32 %v527_v45, %v371_v46  ;;  %v603_v48 = vpop.f32.mrb[1].mxu1 }
 0x21c   :  { %v374_v49 = vpop.f32.mrb[2].mxu1 }
 0x21d   :  { %v377_v50 = vmax.f32 %v372_v47, 0.0  ;;  %v604_v51 = vpop.f32.mrb[3].mxu1 }
 0x21f   :  { %v378_v52 = vpack.c.bf16 %v377_v50, %v377_v50 }
 0x221   :  { %622 = vmatmul.mubr.bf16.vlgmr.msra.gmra.mrb[4].mxu0 %v378_v52 }
 0x2f4   :  { %v484_v54 = vpop.f32.mrb[4].mxu0 }
 0x2f5   :  { %v485_v55 = vadd.f32 %v536_v53, %v484_v54  ;;  %v623_v56 = vpop.f32.mrb[5].mxu0 }
 0x2f6   :  { %v487_v57 = vpop.f32.mrb[6].mxu0 }
 0x2f7   :  { %490 = vst [vmem:[#allocation10] sm:$0xff] %v485_v55  ;;  %v624_v58 = vpop.f32.mrb[7].mxu0 }
 0x2f8   :  { %767 = shalt.err (!%p764_p8)
}
 0x2f9   :  { %s768_s6 = scalar_lea.hbm %s938_s7, 128 }
 0x2fa   :  { %p769_p9 = scmp.ne.s32.totalorder %s938_s7, %s768_s6  ;;  %p772_p10 = scmp.lt.u32.totalorder %s768_s6, %s938_s7 }
 0x2fc   :  { %p774_p11 = pnand %p772_p10, %p769_p9 }
 0x2fe   :  { %777 = shalt.err (!%p774_p11)
}
 0x2ff   :  { %500 = dma.vmem_to_hbm [thread:$0]  %s498_s29, 128, %s938_s7, [#allocation4]  }
 0x300   :  { %784 = dma.done.wait [#allocation4], 128  }
 0x301   :  { %785 = vsyncadd [#allocation4], 4294967168 }
 0x302   :  { %504 = vsyncpa [#allocation3], 1 }
 0x303   :  { %505 = vsyncpa [#allocation6], 1 }
 0x304   :  { %506 = vsyncpa [#allocation9], 1 }
 0x305   :  { %507 = vsyncpa [#allocation4], 1 }

</bundles_post_ra>
